<compile_context>
chip_gen: v7x
topology: tpu7x:2x2x1
jax: 0.10.0
libtpu: 0.0.40
codegen_flags: <defaults>
</compile_context>

<pallas_src>
import jax
import jax.numpy as jnp
from jax.experimental import pallas as pl
from jax.experimental.pallas import tpu as pltpu


_LANE = 128   # lane width (last dim)
_SUB = 8      # sublane width (second-to-last dim)


def _round_up(n, m):
    return ((n + m - 1) // m) * m


def _make_mlp_kernel(num_layers):
    """Fused MLP kernel for `num_layers` Linear layers.

    Signature: (x_ref, w0_ref, b0_ref, w1_ref, b1_ref, ..., out_ref)
    ReLU after every layer except the last (matches NeuralBanditModel.forward).
    Activations / bias / ReLU in f32; dot inputs are cast to the weight dtype
    with f32 accumulation on the MXU.
    """

    def kernel(*refs):
        x_ref = refs[0]
        out_ref = refs[-1]
        param_refs = refs[1:-1]

        h = x_ref[...].astype(jnp.float32)          # load once per batch tile
        for i in range(num_layers):                 # unrolled (static) layer loop
            w = param_refs[2 * i][...]              # (in_pad, out_pad)
            b = param_refs[2 * i + 1][...]          # (1, out_pad), f32
            h = jnp.dot(h.astype(w.dtype), w,
                        preferred_element_type=jnp.float32) + b
            if i != num_layers - 1:
                h = jnp.maximum(h, 0.0)             # ReLU (f32, VPU)
        # Only the first num_actions lanes are real; narrow (masked) store.
        n_out = out_ref.shape[-1]
        out_ref[...] = h[:, :n_out].astype(out_ref.dtype)

    return kernel


def prepare_params(weights, biases, *, param_dtype=jnp.float32):
    """One-time packing of the Linear parameters for the fused kernel.

    weights[i]: (in_dim, out_dim) float32  (transpose of nn.Linear.weight)
    biases[i]:  (out_dim,)        float32

    Pads each layer's output dim to 128 lanes (exact under x@W+b and ReLU,
    since the padded columns stay exactly zero), matches each layer's input
    dim to the previous layer's padded output, and casts to param_dtype.
    Call this ONCE (e.g. after (re)training), not per forward call.
    """
    num_layers = len(weights)
    context_dim = weights[0].shape[0]
    num_actions = weights[-1].shape[1]

    out_pads = [_round_up(w.shape[1], _LANE) for w in weights]
    in_pads = [context_dim] + out_pads[:-1]   # x's feature dim is NOT padded

    params = []
    for i, (w, b) in enumerate(zip(weights, biases)):
        w_p = jnp.pad(jnp.asarray(w, jnp.float32),
                      ((0, in_pads[i] - w.shape[0]),
                       (0, out_pads[i] - w.shape[1]))).astype(param_dtype)
        b_p = jnp.pad(jnp.asarray(b, jnp.float32),
                      (0, out_pads[i] - b.shape[0])).reshape(1, -1)
        params.append(w_p)
        params.append(b_p)

    return {
        "params": tuple(params),
        "num_layers": num_layers,
        "context_dim": context_dim,
        "num_actions": num_actions,
    }


def neural_bandit_forward(x, prepared, *, batch_tile=1024):
    """Fused MLP forward pass in a single pallas_call.

    x:        (batch, context_dim)  (float32 or bfloat16)
    prepared: output of prepare_params()
    returns:  (batch, num_actions) float32
    """
    params = prepared["params"]
    num_layers = prepared["num_layers"]
    context_dim = prepared["context_dim"]
    num_actions = prepared["num_actions"]

    batch = x.shape[0]
    assert x.shape[1] == context_dim, (x.shape, context_dim)

    # Batch tile: multiple of 8, capped at batch_tile; split into >= 2 tiles
    # whenever the batch allows so the "parallel" grid axis can span both
    # TensorCores on v7x (harmless on v5e/v6e, which have a single TC).
    half = -(-batch // 2)
    tb = max(_SUB, min(batch_tile, _round_up(half, _SUB)))
    b_pad = _round_up(batch, tb)
    n_tiles = b_pad // tb

    x_p = x if b_pad == batch else jnp.pad(x, ((0, b_pad - batch), (0, 0)))

    kernel = _make_mlp_kernel(num_layers)

    # x / out are batch-tiled; weights & biases are full-array blocks pinned to
    # block (0, 0) every step, so they stay resident in VMEM.
    x_spec = pl.BlockSpec((tb, context_dim), lambda i: (i, 0))
    param_specs = [pl.BlockSpec(p.shape, lambda i: (0, 0)) for p in params]
    out_spec = pl.BlockSpec((tb, num_actions), lambda i: (i, 0))
    out_shape = jax.ShapeDtypeStruct((b_pad, num_actions), jnp.float32)

    fn = pl.pallas_call(
        kernel,
        grid=(n_tiles,),
        in_specs=[x_spec] + param_specs,
        out_specs=out_spec,
        out_shape=out_shape,
        compiler_params=pltpu.CompilerParams(
            # batch tiles are independent -> shard across TCs on v7x
            dimension_semantics=("parallel",),
        ),
    )
    out_p = fn(x_p, *params)
    return out_p if b_pad == batch else out_p[:batch]


def neural_bandit_apply(x, weights, biases, *, param_dtype=jnp.float32,
                        batch_tile=1024):
    """Convenience one-shot wrapper. For repeated serving/training calls,
    hoist prepare_params() out of the loop and call neural_bandit_forward."""
    prepared = prepare_params(weights, biases, param_dtype=param_dtype)
    return neural_bandit_forward(x, prepared, batch_tile=batch_tile)


def init_params(key, context_dim, layer_sizes, num_actions, init_scale=0.3):
    """Parameter init mirroring NeuralBanditModel.build_model.

    Weights: uniform(-init_scale, init_scale)  (nn.init.uniform_ in build_layer)
    Biases:  PyTorch Linear default uniform(-1/sqrt(in_dim), 1/sqrt(in_dim)).
    Weights are produced directly in (in_dim, out_dim) layout (transpose of
    nn.Linear's (out, in)) so the kernel computes y = x @ W + b.
    """
    dims = [context_dim] + list(layer_sizes) + [num_actions]
    weights, biases = [], []
    for i in range(len(dims) - 1):
        in_dim, out_dim = dims[i], dims[i + 1]
        key, wk, bk = jax.random.split(key, 3)
        w = jax.random.uniform(
            wk, (in_dim, out_dim), jnp.float32, -init_scale, init_scale)
        bound = 1.0 / jnp.sqrt(jnp.float32(in_dim))
        b = jax.random.uniform(bk, (out_dim,), jnp.float32, -bound, bound)
        weights.append(w)
        biases.append(b)
    return weights, biases


def reference_forward(x, weights, biases, param_dtype=jnp.float32):
    """Pure-JAX reference matching NeuralBanditModel.forward.

    Uses the same cast scheme as the kernel (inputs/weights cast to
    param_dtype, f32 accumulation). For the f32 path the reference dot runs at
    HIGHEST precision so it is the accurate baseline.
    """
    prec = jax.lax.Precision.HIGHEST if param_dtype == jnp.float32 else None
    h = x.astype(jnp.float32)
    n = len(weights)
    for i, (w, b) in enumerate(zip(weights, biases)):
        h = jnp.dot(h.astype(param_dtype), w.astype(param_dtype),
                    preferred_element_type=jnp.float32,
                    precision=prec) + b.astype(jnp.float32)
        if i != n - 1:
            h = jax.nn.relu(h)
    return h


# TODO(synk): training-side pieces of the module (RMSprop optimizer, MSE loss,
# backward pass, grad clipping, lr decay, train loop) are host/optimizer logic
# with no forward-pass Pallas equivalent and are intentionally not implemented.


if __name__ == "__main__":
    # Small, deterministic shapes implied by the module's hparams.
    context_dim = 16
    layer_sizes = [32, 32]
    num_actions = 4

    key = jax.random.PRNGKey(0)
    key, xk1, xk2, xk3 = jax.random.split(key, 4)
    weights, biases = init_params(key, context_dim, layer_sizes, num_actions)

    # One-time parameter packing (hoisted out of the per-call path).
    prep_f32 = prepare_params(weights, biases, param_dtype=jnp.float32)
    prep_bf16 = prepare_params(weights, biases, param_dtype=jnp.bfloat16)

    # --- Test 1: tiny batch (single grid tile), f32 parameters. ---
    x_small = jax.random.normal(xk1, (2, context_dim), jnp.float32)
    out_small = jax.block_until_ready(neural_bandit_forward(x_small, prep_f32))
    ref_small = reference_forward(x_small, weights, biases, jnp.float32)
    assert out_small.shape == (2, num_actions)
    assert jnp.allclose(out_small, ref_small, atol=1e-2, rtol=1e-2), (
        out_small, ref_small)

    # --- Test 2: non-multiple batch -> batch padding + >=2 pipelined tiles. ---
    x_mid = jax.random.normal(xk2, (300, context_dim), jnp.float32)
    out_mid = jax.block_until_ready(neural_bandit_forward(x_mid, prep_f32))
    ref_mid = reference_forward(x_mid, weights, biases, jnp.float32)
    assert out_mid.shape == (300, num_actions)
    assert jnp.allclose(out_mid, ref_mid, atol=1e-2, rtol=1e-2)

    # --- Test 3: typical bandit batch (512), bf16 fast path, 2 tiles. ---
    x_big = jax.random.normal(xk3, (512, context_dim), jnp.float32)
    out_big = jax.block_until_ready(neural_bandit_forward(x_big, prep_bf16))
    ref_big = reference_forward(x_big, weights, biases, jnp.bfloat16)
    assert out_big.shape == (512, num_actions)
    assert jnp.allclose(out_big, ref_big, atol=2e-3, rtol=2e-3)

    print("KERNEL_OK")
</pallas_src>

<mosaic_0001>
module attributes {stable_mosaic.version = 11 : i64} {
  func.func @kernel(%arg0: i32, %arg1: memref<8x16xf32, #tpu.memory_space<vmem>>, %arg2: memref<16x128xf32, #tpu.memory_space<vmem>>, %arg3: memref<1x128xf32, #tpu.memory_space<vmem>>, %arg4: memref<128x128xf32, #tpu.memory_space<vmem>>, %arg5: memref<1x128xf32, #tpu.memory_space<vmem>>, %arg6: memref<128x128xf32, #tpu.memory_space<vmem>>, %arg7: memref<1x128xf32, #tpu.memory_space<vmem>>, %arg8: memref<8x4xf32, #tpu.memory_space<vmem>>) attributes {dimension_semantics = [#tpu.dimension_semantics<parallel>], iteration_bounds = array<i64: 1>, scalar_prefetch = 0 : i64, scratch_operands = 0 : i64, tpu.core_type = #tpu.core_type<tc>, window_params = [{transform_indices = @transform_0, window_bounds = array<i64: 8, 16>}, {pipeline_mode = #tpu.pipeline_mode<synchronous>, transform_indices = @transform_1, window_bounds = array<i64: 16, 128>}, {pipeline_mode = #tpu.pipeline_mode<synchronous>, transform_indices = @transform_2, window_bounds = array<i64: 1, 128>}, {pipeline_mode = #tpu.pipeline_mode<synchronous>, transform_indices = @transform_3, window_bounds = array<i64: 128, 128>}, {pipeline_mode = #tpu.pipeline_mode<synchronous>, transform_indices = @transform_4, window_bounds = array<i64: 1, 128>}, {pipeline_mode = #tpu.pipeline_mode<synchronous>, transform_indices = @transform_5, window_bounds = array<i64: 128, 128>}, {pipeline_mode = #tpu.pipeline_mode<synchronous>, transform_indices = @transform_6, window_bounds = array<i64: 1, 128>}, {transform_indices = @transform_7, window_bounds = array<i64: 8, 4>}]} {
    %c0 = arith.constant 0 : index
    %c0_0 = arith.constant 0 : index
    %0 = vector.load %arg1[%c0, %c0_0] : memref<8x16xf32, #tpu.memory_space<vmem>>, vector<8x16xf32>
    %c0_1 = arith.constant 0 : index
    %c0_2 = arith.constant 0 : index
    %1 = vector.load %arg2[%c0_1, %c0_2] : memref<16x128xf32, #tpu.memory_space<vmem>>, vector<16x128xf32>
    %c0_3 = arith.constant 0 : index
    %c0_4 = arith.constant 0 : index
    %2 = vector.load %arg3[%c0_3, %c0_4] : memref<1x128xf32, #tpu.memory_space<vmem>>, vector<1x128xf32>
    %cst = arith.constant dense<0.000000e+00> : vector<8x128xf32>
    %3 = tpu.matmul %0, %1, %cst {dimension_numbers = #tpu.dot_dimension_numbers<[1], [0], [0], [1], [0, 0, 1, 1], [], []>} : vector<8x16xf32>, vector<16x128xf32>, vector<8x128xf32> -> vector<8x128xf32>
    %4 = vector.broadcast %2 : vector<1x128xf32> to vector<8x128xf32>
    %5 = arith.addf %3, %4 : vector<8x128xf32>
    %cst_5 = arith.constant 0.000000e+00 : f32
    %6 = vector.broadcast %cst_5 : f32 to vector<8x128xf32>
    %7 = arith.maximumf %5, %6 : vector<8x128xf32>
    %c0_6 = arith.constant 0 : index
    %c0_7 = arith.constant 0 : index
    %8 = vector.load %arg4[%c0_6, %c0_7] : memref<128x128xf32, #tpu.memory_space<vmem>>, vector<128x128xf32>
    %c0_8 = arith.constant 0 : index
    %c0_9 = arith.constant 0 : index
    %9 = vector.load %arg5[%c0_8, %c0_9] : memref<1x128xf32, #tpu.memory_space<vmem>>, vector<1x128xf32>
    %cst_10 = arith.constant dense<0.000000e+00> : vector<8x128xf32>
    %10 = tpu.matmul %7, %8, %cst_10 {dimension_numbers = #tpu.dot_dimension_numbers<[1], [0], [0], [1], [0, 0, 1, 1], [], []>} : vector<8x128xf32>, vector<128x128xf32>, vector<8x128xf32> -> vector<8x128xf32>
    %11 = vector.broadcast %9 : vector<1x128xf32> to vector<8x128xf32>
    %12 = arith.addf %10, %11 : vector<8x128xf32>
    %cst_11 = arith.constant 0.000000e+00 : f32
    %13 = vector.broadcast %cst_11 : f32 to vector<8x128xf32>
    %14 = arith.maximumf %12, %13 : vector<8x128xf32>
    %c0_12 = arith.constant 0 : index
    %c0_13 = arith.constant 0 : index
    %15 = vector.load %arg6[%c0_12, %c0_13] : memref<128x128xf32, #tpu.memory_space<vmem>>, vector<128x128xf32>
    %c0_14 = arith.constant 0 : index
    %c0_15 = arith.constant 0 : index
    %16 = vector.load %arg7[%c0_14, %c0_15] : memref<1x128xf32, #tpu.memory_space<vmem>>, vector<1x128xf32>
    %cst_16 = arith.constant dense<0.000000e+00> : vector<8x128xf32>
    %17 = tpu.matmul %14, %15, %cst_16 {dimension_numbers = #tpu.dot_dimension_numbers<[1], [0], [0], [1], [0, 0, 1, 1], [], []>} : vector<8x128xf32>, vector<128x128xf32>, vector<8x128xf32> -> vector<8x128xf32>
    %18 = vector.broadcast %16 : vector<1x128xf32> to vector<8x128xf32>
    %19 = arith.addf %17, %18 : vector<8x128xf32>
    %20 = vector.extract_strided_slice %19 {offsets = [0, 0], sizes = [8, 4], strides = [1, 1]} : vector<8x128xf32> to vector<8x4xf32>
    %c0_17 = arith.constant 0 : index
    %c0_18 = arith.constant 0 : index
    %21 = vector.load %arg8[%c0_17, %c0_18] : memref<8x4xf32, #tpu.memory_space<vmem>>, vector<8x4xf32>
    tpu.vector_store %arg8[%c0_17, %c0_18], %20 {strides = array<i32>} : memref<8x4xf32, #tpu.memory_space<vmem>>, vector<8x4xf32>,
    return
  }
  func.func @transform_0(%arg0: i32) -> (i32, i32) {
    %c0_i32 = arith.constant 0 : i32
    %c0_i32_0 = arith.constant 0 : i32
    return %arg0, %c0_i32 : i32, i32
  }
  func.func @transform_1(%arg0: i32) -> (i32, i32) {
    %c0_i32 = arith.constant 0 : i32
    %c0_i32_0 = arith.constant 0 : i32
    %c0_i32_1 = arith.constant 0 : i32
    return %c0_i32, %c0_i32_0 : i32, i32
  }
  func.func @transform_2(%arg0: i32) -> (i32, i32) {
    %c0_i32 = arith.constant 0 : i32
    %c0_i32_0 = arith.constant 0 : i32
    %c0_i32_1 = arith.constant 0 : i32
    return %c0_i32, %c0_i32_0 : i32, i32
  }
  func.func @transform_3(%arg0: i32) -> (i32, i32) {
    %c0_i32 = arith.constant 0 : i32
    %c0_i32_0 = arith.constant 0 : i32
    %c0_i32_1 = arith.constant 0 : i32
    return %c0_i32, %c0_i32_0 : i32, i32
  }
  func.func @transform_4(%arg0: i32) -> (i32, i32) {
    %c0_i32 = arith.constant 0 : i32
    %c0_i32_0 = arith.constant 0 : i32
    %c0_i32_1 = arith.constant 0 : i32
    return %c0_i32, %c0_i32_0 : i32, i32
  }
  func.func @transform_5(%arg0: i32) -> (i32, i32) {
    %c0_i32 = arith.constant 0 : i32
    %c0_i32_0 = arith.constant 0 : i32
    %c0_i32_1 = arith.constant 0 : i32
    return %c0_i32, %c0_i32_0 : i32, i32
  }
  func.func @transform_6(%arg0: i32) -> (i32, i32) {
    %c0_i32 = arith.constant 0 : i32
    %c0_i32_0 = arith.constant 0 : i32
    %c0_i32_1 = arith.constant 0 : i32
    return %c0_i32, %c0_i32_0 : i32, i32
  }
  func.func @transform_7(%arg0: i32) -> (i32, i32) {
    %c0_i32 = arith.constant 0 : i32
    %c0_i32_0 = arith.constant 0 : i32
    return %arg0, %c0_i32 : i32, i32
  }
}

</mosaic_0001>

<bundles_post_ra>
// kernel: tpu_custom_call.1
= control target key start
LH: loop header
LB: loop body
LE: loop exit
PB: predicated region body
PF: predicated region fallthrough
CT: control target
= control target key end

     0   :  { %12 = vsyncpa [#allocation3], 0  ;;  %s770_s0 = inlined_call_operand.hbm [shape: f32[8,16], index: 0, kind: input, shape index: {}]   ;;  %s771_s1 = inlined_call_operand.hbm [shape: f32[16,128], index: 1, kind: input, shape index: {}]   ;;  %s772_s2 = inlined_call_operand.vmem [shape: f32[1,128], index: 2, kind: input, shape index: {}]   ;;  %s773_s3 = inlined_call_operand.hbm [shape: f32[128,128], index: 3, kind: input, shape index: {}]   ;;  %s774_s4 = inlined_call_operand.vmem [shape: f32[1,128], index: 4, kind: input, shape index: {}]   ;;  %s775_s5 = inlined_call_operand.hbm [shape: f32[128,128], index: 5, kind: input, shape index: {}]   ;;  %s776_s6 = inlined_call_operand.vmem [shape: f32[1,128], index: 6, kind: input, shape index: {}]   ;;  %s777_s7 = inlined_call_operand.vmem [shape: f32[8,4], index: 7, kind: output, shape index: {}]  }
   0x1   :  { %13 = vsyncpa [#allocation5], 0 }
   0x2   :  { %14 = vsyncpa [#allocation8], 0  ;;  %s632_s24 = smov [#allocation4]   ;;  %s538_s28 = scalar_lea.hbm %s771_s1, 256 }
   0x3   :  { %s30_s25 = sshll.u32 %s632_s24, 4  ;;  %p539_p0 = scmp.ne.s32.totalorder %s771_s1, %s538_s28  ;;  %s31_s25 = int_to_ptr.vmem [resolvable:$true] %s30_s25 }
   0x4   :  { %p542_p1 = scmp.lt.u32.totalorder %s538_s28, %s771_s1 }
   0x6   :  { %p544_p2 = pnand %p542_p1, %p539_p0 }
   0x8   :  { %547 = shalt.err (!%p544_p2)
}
   0x9   :  { %s548_s10 = scalar_lea.vmem %s31_s25, 256  ;;  %p553_p4 = scmp.lt.s32.totalorder %s31_s25, %s31_s25 }
   0xa   :  { %p549_p3 = scmp.ne.s32.totalorder %s31_s25, %s548_s10  ;;  %p554_p5 = scmp.lt.s32.totalorder %s548_s10, %s548_s10 }
   0xc   :  { %p555_p6 = por %p554_p5, %p553_p4 }
   0xe   :  { %p556_p7 = pnand %p555_p6, %p549_p3 }
  0x10   :  { %559 = shalt.err (!%p556_p7)
}
  0x11   :  { %s633_s11 = smov 128   ;;  %s634_s12 = smov 8  }
  0x12   :  { %36 = dma.hbm_to_vmem [thread:$0]  %s771_s1, 256, %s31_s25, [#allocation5], %s633_s11, %s633_s11, %s634_s12  }
  0x13   :  { %s635_s15 = smov [#allocation2]   ;;  %s636_s17 = smov [#allocation6]  }
  0x14   :  { %s21_s16 = sshll.u32 %s635_s15, 4  ;;  %s44_s18 = sshll.u32 %s636_s17, 4  ;;  %s22_s16 = int_to_ptr.vmem [resolvable:$true] %s21_s16  ;;  %s45_s18 = int_to_ptr.vmem [resolvable:$true] %s44_s18 }
  0x15   :  { %s560_s21 = scalar_lea.hbm %s770_s0, 128 }
  0x16   :  { %p561_p8 = scmp.ne.s32.totalorder %s770_s0, %s560_s21  ;;  %p564_p9 = scmp.lt.u32.totalorder %s560_s21, %s770_s0 }
  0x18   :  { %p566_p10 = pnand %p564_p9, %p561_p8 }
  0x1a   :  { %569 = shalt.err (!%p566_p10)
}
  0x1b   :  { %s570_s1 = scalar_lea.vmem %s22_s16, 128  ;;  %p575_p12 = scmp.lt.s32.totalorder %s22_s16, %s22_s16 }
  0x1c   :  { %p571_p11 = scmp.ne.s32.totalorder %s22_s16, %s570_s1  ;;  %p576_p13 = scmp.lt.s32.totalorder %s570_s1, %s570_s1 }
  0x1e   :  { %p577_p0 = por %p576_p13, %p575_p12 }
  0x20   :  { %p578_p1 = pnand %p577_p0, %p571_p11 }
  0x22   :  { %581 = shalt.err (!%p578_p1)
}
  0x23   :  { %24 = dma.hbm_to_vmem [thread:$0]  %s770_s0, 128, %s22_s16, [#allocation3]  }
  0x24   :  { %s582_s30 = scalar_lea.hbm %s773_s3, 2048 }
  0x25   :  { %p583_p2 = scmp.ne.s32.totalorder %s773_s3, %s582_s30  ;;  %p586_p3 = scmp.lt.u32.totalorder %s582_s30, %s773_s3 }
  0x27   :  { %p588_p4 = pnand %p586_p3, %p583_p2 }
  0x29   :  { %591 = shalt.err (!%p588_p4)
}
  0x2a   :  { %s592_s14 = scalar_lea.vmem %s45_s18, 2048  ;;  %p597_p6 = scmp.lt.s32.totalorder %s45_s18, %s45_s18 }
  0x2b   :  { %p593_p5 = scmp.ne.s32.totalorder %s45_s18, %s592_s14  ;;  %p598_p7 = scmp.lt.s32.totalorder %s592_s14, %s592_s14 }
  0x2d   :  { %p599_p8 = por %p598_p7, %p597_p6 }
  0x2f   :  { %p600_p9 = pnand %p599_p8, %p593_p5 }
  0x31   :  { %603 = shalt.err (!%p600_p9)
}
  0x32   :  { %50 = dma.hbm_to_vmem [thread:$0]  %s773_s3, 2048, %s45_s18, [#allocation5], %s633_s11, %s633_s11, %s634_s12  }
  0x33   :  { %s637_s16 = smov [#allocation7]   ;;  %s604_s21 = scalar_lea.hbm %s775_s5, 2048 }
  0x34   :  { %s58_s17 = sshll.u32 %s637_s16, 4  ;;  %p605_p10 = scmp.ne.s32.totalorder %s775_s5, %s604_s21  ;;  %s59_s17 = int_to_ptr.vmem [resolvable:$true] %s58_s17 }
  0x35   :  { %p608_p11 = scmp.lt.u32.totalorder %s604_s21, %s775_s5 }
  0x37   :  { %p610_p12 = pnand %p608_p11, %p605_p10 }
  0x39   :  { %613 = shalt.err (!%p610_p12)
}
  0x3a   :  { %s614_s1 = scalar_lea.vmem %s59_s17, 2048  ;;  %p619_p0 = scmp.lt.s32.totalorder %s59_s17, %s59_s17 }
  0x3b   :  { %p615_p13 = scmp.ne.s32.totalorder %s59_s17, %s614_s1  ;;  %p620_p1 = scmp.lt.s32.totalorder %s614_s1, %s614_s1 }
  0x3d   :  { %p621_p2 = por %p620_p1, %p619_p0 }
  0x3f   :  { %p622_p3 = pnand %p621_p2, %p615_p13 }
  0x41   :  { %625 = shalt.err (!%p622_p3)
}
  0x42   :  { %64 = dma.hbm_to_vmem [thread:$0]  %s775_s5, 2048, %s59_s17, [#allocation8], %s633_s11, %s633_s11, %s634_s12  }
  0x43   :  { %626 = dma.done.wait [#allocation3], 128  }
  0x44   :  { %627 = vsyncadd [#allocation3], 4294967168 }
  0x45   :  { %628 = dma.done.wait [#allocation5], 2304  }
  0x46   :  { %629 = vsyncadd [#allocation5], 4294964992 }
  0x47   :  { %630 = dma.done.wait [#allocation8], 2048  }
  0x48   :  { %631 = vsyncadd [#allocation8], 4294965248  ;;  %v638_v0 = vmov 0.0|0.0   ;;  %vm639_vm0 = vmmov 0   ;;  %v640_v1 = vmov 0.0   ;;  %v80_v2 = vld [vmem:[#allocation4] sm:$0xff] }
  0x49   :  { %478 = vmatprep.subr.bf16.mxu0 %v638_v0  ;;  %405 = vmatprep.mubr.msk.f32.mxu0 %vm639_vm0, %v640_v1  ;;  %v81_v3 = vld [vmem:[#allocation4 + $0x8] sm:$0xff]  ;;  %v164_v5 = vld [vmem:[#allocation6] sm:$0xff]  ;;  %v165_v6 = vld [vmem:[#allocation6 + $0x8] sm:$0xff]  ;;  %vm89_vm1 = vcmask 130048   ;;  %vm351_vm2 = vcmask 31744  }
  0x4a   :  { %481 = vmatprep.subr.bf16.mxu1 %v638_v0  ;;  %440 = vmatprep.mubr.msk.f32.mxu1 %vm639_vm0, %v640_v1  ;;  %v479_v4 = vpack.c.bf16 %v81_v3, %v80_v2  ;;  %v166_v7 = vld [vmem:[#allocation6 + $0x10] sm:$0xff]  ;;  %v482_v8 = vpack.c.bf16 %v165_v6, %v164_v5  ;;  %v167_v9 = vld [vmem:[#allocation6 + $0x18] sm:$0xff]  ;;  %v79_v10 = vld [vmem:[#allocation2] sm:$0xff] }
  0x4b   :  { %v485_v11 = vpack.c.bf16 %v167_v9, %v166_v7  ;;  %v168_v12 = vld [vmem:[#allocation6 + $0x20] sm:$0xff]  ;;  %v169_v13 = vld [vmem:[#allocation6 + $0x28] sm:$0xff]  ;;  %v170_v15 = vld [vmem:[#allocation6 + $0x30] sm:$0xff] }
  0x4c   :  { %480 = vmatpush3.bf16.msra.mxu0 %v479_v4  ;;  %483 = vmatpush3.bf16.msra.mxu1 %v482_v8  ;;  %v488_v14 = vpack.c.bf16 %v169_v13, %v168_v12  ;;  %v171_v16 = vld [vmem:[#allocation6 + $0x38] sm:$0xff]  ;;  %v172_v18 = vld [vmem:[#allocation6 + $0x40] sm:$0xff]  ;;  %v173_v19 = vld [vmem:[#allocation6 + $0x48] sm:$0xff] }
  0x4d   :  { %505 = vmatprep.subr.bf16.mxu0 %v638_v0  ;;  %484 = vmatprep.subr.bf16.mxu1 %v638_v0  ;;  %v491_v17 = vpack.c.bf16 %v171_v16, %v170_v15  ;;  %v494_v20 = vpack.c.bf16 %v173_v19, %v172_v18  ;;  %v174_v21 = vld [vmem:[#allocation6 + $0x50] sm:$0xff]  ;;  %v175_v22 = vld [vmem:[#allocation6 + $0x58] sm:$0xff]  ;;  %v176_v24 = vld [vmem:[#allocation6 + $0x60] sm:$0xff] }
  0x4e   :  { %v497_v23 = vpack.c.bf16 %v175_v22, %v174_v21  ;;  %v177_v25 = vld [vmem:[#allocation6 + $0x68] sm:$0xff]  ;;  %v178_v27 = vld [vmem:[#allocation6 + $0x70] sm:$0xff]  ;;  %v179_v28 = vld [vmem:[#allocation6 + $0x78] sm:$0xff] }
  0x4f   :  { %406 = vmatmul.mubr.msk.f32.vlgmr.msra.gmra.mrb[0].mxu0 %vm89_vm1, %v79_v10  ;;  %v500_v26 = vpack.c.bf16 %v177_v25, %v176_v24  ;;  %v503_v29 = vpack.c.bf16 %v179_v28, %v178_v27  ;;  %v258_v30 = vld [vmem:[#allocation7] sm:$0xff]  ;;  %v259_v31 = vld [vmem:[#allocation7 + $0x8] sm:$0xff]  ;;  %v260_v32 = vld [vmem:[#allocation7 + $0x10] sm:$0xff] }
  0x50   :  { %475 = vmatprep.mubr.msk.f32.mxu0 %vm639_vm0, %v640_v1  ;;  %486 = vmatpush3.bf16.msra.mxu1 %v485_v11  ;;  %v506_v33 = vpack.c.bf16 %v259_v31, %v258_v30  ;;  %v261_v34 = vld [vmem:[#allocation7 + $0x18] sm:$0xff]  ;;  %v262_v36 = vld [vmem:[#allocation7 + $0x20] sm:$0xff]  ;;  %v263_v37 = vld [vmem:[#allocation7 + $0x28] sm:$0xff] }
  0x51   :  { %487 = vmatprep.subr.bf16.mxu1 %v638_v0  ;;  %v509_v35 = vpack.c.bf16 %v261_v34, %v260_v32  ;;  %v512_v38 = vpack.c.bf16 %v263_v37, %v262_v36  ;;  %v264_v39 = vld [vmem:[#allocation7 + $0x30] sm:$0xff]  ;;  %v265_v40 = vld [vmem:[#allocation7 + $0x38] sm:$0xff]  ;;  %v266_v42 = vld [vmem:[#allocation7 + $0x40] sm:$0xff] }
  0x52   :  { %507 = vmatpush3.bf16.msra.mxu0 %v506_v33  ;;  %v515_v41 = vpack.c.bf16 %v265_v40, %v264_v39  ;;  %v267_v43 = vld [vmem:[#allocation7 + $0x48] sm:$0xff]  ;;  %v268_v45 = vld [vmem:[#allocation7 + $0x50] sm:$0xff]  ;;  %v269_v46 = vld [vmem:[#allocation7 + $0x58] sm:$0xff] }
  0x53   :  { %508 = vmatprep.subr.bf16.mxu0 %v638_v0  ;;  %v518_v44 = vpack.c.bf16 %v267_v43, %v266_v42  ;;  %v521_v47 = vpack.c.bf16 %v269_v46, %v268_v45  ;;  %v270_v48 = vld [vmem:[#allocation7 + $0x60] sm:$0xff]  ;;  %v271_v49 = vld [vmem:[#allocation7 + $0x68] sm:$0xff]  ;;  %v272_v56 = vld [vmem:[#allocation7 + $0x70] sm:$0xff] }
  0x54   :  { %489 = vmatpush3.bf16.msra.mxu1 %v488_v14  ;;  %v524_v50 = vpack.c.bf16 %v271_v49, %v270_v48  ;;  %v360_v51 = vld [vmem:[%s772_s2] ss:$0 sm:$0xff]  ;;  %v273_v57 = vld [vmem:[#allocation7 + $0x78] sm:$0xff] }
  0x55   :  { %490 = vmatprep.subr.bf16.mxu1 %v638_v0  ;;  %v527_v58 = vpack.c.bf16 %v273_v57, %v272_v56  ;;  %v362_v59 = vld [vmem:[%s774_s4] ss:$0 sm:$0xff] }
  0x56   :  { %510 = vmatpush3.bf16.msra.mxu0 %v509_v35 }
  0x57   :  { %511 = vmatprep.subr.bf16.mxu0 %v638_v0 }
  0x58   :  { %492 = vmatpush3.bf16.msra.mxu1 %v491_v17 }
  0x59   :  { %493 = vmatprep.subr.bf16.mxu1 %v638_v0 }
  0x5a   :  { %513 = vmatpush3.bf16.msra.mxu0 %v512_v38 }
  0x5b   :  { %514 = vmatprep.subr.bf16.mxu0 %v638_v0 }
  0x5c   :  { %495 = vmatpush3.bf16.msra.mxu1 %v494_v20 }
  0x5d   :  { %496 = vmatprep.subr.bf16.mxu1 %v638_v0 }
  0x5e   :  { %516 = vmatpush3.bf16.msra.mxu0 %v515_v41 }
  0x5f   :  { %517 = vmatprep.subr.bf16.mxu0 %v638_v0 }
  0x60   :  { %498 = vmatpush3.bf16.msra.mxu1 %v497_v23 }
  0x61   :  { %499 = vmatprep.subr.bf16.mxu1 %v638_v0 }
  0x62   :  { %519 = vmatpush3.bf16.msra.mxu0 %v518_v44 }
  0x63   :  { %520 = vmatprep.subr.bf16.mxu0 %v638_v0 }
  0x64   :  { %501 = vmatpush3.bf16.msra.mxu1 %v500_v26 }
  0x65   :  { %502 = vmatprep.subr.bf16.mxu1 %v638_v0 }
  0x66   :  { %522 = vmatpush3.bf16.msra.mxu0 %v521_v47 }
  0x67   :  { %523 = vmatprep.subr.bf16.mxu0 %v638_v0 }
  0x68   :  { %504 = vmatpush3.bf16.msra.mxu1 %v503_v29 }
  0x6a   :  { %525 = vmatpush3.bf16.msra.mxu0 %v524_v50 }
  0x6b   :  { %526 = vmatprep.subr.bf16.mxu0 %v638_v0  ;;  %v363_v0 = vld [vmem:[%s776_s6] ss:$0 sm:$0xff] }
  0x6e   :  { %528 = vmatpush3.bf16.msra.mxu0 %v527_v58 }
 0x122   :  { %v159_v52 = vpop.f32.mrb[0].mxu0 }
 0x123   :  { %v160_v53 = vadd.f32 %v360_v51, %v159_v52  ;;  %v407_v54 = vpop.f32.mrb[1].mxu0 }
 0x125   :  { %v163_v55 = vmax.f32 %v160_v53, 0.0 }
 0x127   :  { %441 = vmatmul.mubr.f32.vlgmr.msra.gmra.mrb[0].mxu1 %v163_v55 }
 0x1fa   :  { %v253_v60 = vpop.f32.mrb[0].mxu1 }
 0x1fb   :  { %v254_v61 = vadd.f32 %v362_v59, %v253_v60  ;;  %v442_v62 = vpop.f32.mrb[1].mxu1 }
 0x1fd   :  { %v257_v63 = vmax.f32 %v254_v61, 0.0 }
 0x1ff   :  { %476 = vmatmul.mubr.f32.vlgmr.msra.gmra.mrb[2].mxu0 %v257_v63 }
 0x2d2   :  { %v347_v1 = vpop.f32.mrb[2].mxu0 }
 0x2d3   :  { %v348_v2 = vadd.f32 %v363_v0, %v347_v1  ;;  %v477_v3 = vpop.f32.mrb[3].mxu0 }
 0x2d5   :  { %352 = vst.msk [vmem:[%s777_s7] sm:$0xff] %vm351_vm2, %v348_v2 }
 0x2d6   :  { %357 = vsyncpa [#allocation3], 1 }
 0x2d7   :  { %358 = vsyncpa [#allocation5], 1 }
 0x2d8   :  { %359 = vsyncpa [#allocation8], 1 }

</bundles_post_ra>
